<compile_context>
chip_gen: v5e
topology: v5e:2x2
jax: 0.10.0
libtpu: 0.0.40
codegen_flags: <defaults>
</compile_context>

<pallas_src>
import functools

import jax
import jax.numpy as jnp
import numpy as np
from jax.experimental import pallas as pl
from jax.experimental.pallas import tpu as pltpu


# ---------------------------------------------------------------------------
# Hardware-aware policy: (vmem_limit_bytes, streaming_tile_bytes, multi_tc)
# ---------------------------------------------------------------------------
def _tpu_config():
    kind = ""
    try:
        kind = jax.devices()[0].device_kind.lower()
    except Exception:
        pass
    vmem_cap = None
    try:
        vmem_cap = int(pltpu.get_tpu_info().vmem_capacity_bytes)
    except Exception:
        vmem_cap = None
    if vmem_cap is None or vmem_cap <= 0:
        vmem_cap = (64 << 20) if "v7" in kind else (128 << 20)
    # Leave headroom under physical VMEM for Mosaic's own scratch; never ask
    # for more than 64 MiB of scoped VMEM even on 128 MiB parts.
    vmem_limit = min((vmem_cap * 3) // 4, 64 << 20)
    # Streaming spatial-tile target per buffer; 4-6 MiB amortizes the ~0.35us
    # fixed per-grid-step cost at every generation's HBM bandwidth.
    if "v7" in kind:
        tile_bytes = 4 << 20          # small VMEM (64 MiB), fastest HBM
    elif "v6" in kind:
        tile_bytes = 6 << 20
    else:
        tile_bytes = 4 << 20          # v5e: >=2 MiB already <10% step overhead
    # Parts whose TensorCores share "parallel" grid axes (megacore / v7x).
    multi_tc = any(tag in kind for tag in ("v7", "v4", "v5p"))
    return vmem_limit, tile_bytes, multi_tc


# ---------------------------------------------------------------------------
# Fused single-pass kernel: one grid step owns a whole (nb, C, HW) slab.
# ---------------------------------------------------------------------------
def _fused_kernel(x_ref, w1t_ref, w2t_ref, o_ref):
    # x_ref: (nb, C, HW) native dtype; w1t: (C, Cr) f32; w2t: (Cr, C) f32.
    x = x_ref[...]                                       # no full-slab f32 copy
    # AdaptiveAvgPool2d(1): mean over flattened spatial, f32 accumulation.
    pooled = jnp.mean(x, axis=-1, dtype=jnp.float32)     # (nb, C)
    # 1x1 conv (C -> Cr, no bias) + ReLU   (pre-transposed weight: no XLU .T)
    h = jnp.maximum(jnp.dot(pooled, w1t_ref[...],
                            preferred_element_type=jnp.float32), 0.0)
    # 1x1 conv (Cr -> C, no bias) + Sigmoid
    s = jax.nn.sigmoid(jnp.dot(h, w2t_ref[...],
                               preferred_element_type=jnp.float32))   # (nb, C)
    # Channel-wise rescale in native dtype (bf16 stays bf16 on the VPU).
    o_ref[...] = x * s.astype(x.dtype)[:, :, None]


def _fused_call(x, w1t, w2t, nb, vmem_limit):
    N, C, HW = x.shape
    Cr = w1t.shape[1]
    return pl.pallas_call(
        _fused_kernel,
        out_shape=jax.ShapeDtypeStruct((N, C, HW), x.dtype),
        grid_spec=pltpu.PrefetchScalarGridSpec(
            num_scalar_prefetch=0,
            grid=(pl.cdiv(N, nb),),
            in_specs=[
                pl.BlockSpec((nb, C, HW), lambda n: (n, 0, 0)),
                pl.BlockSpec((C, Cr), lambda n: (0, 0)),
                pl.BlockSpec((Cr, C), lambda n: (0, 0)),
            ],
            out_specs=pl.BlockSpec((nb, C, HW), lambda n: (n, 0, 0)),
        ),
        compiler_params=pltpu.CompilerParams(
            dimension_semantics=("parallel",),
            vmem_limit_bytes=vmem_limit),
    )(x, w1t, w2t)


# ---------------------------------------------------------------------------
# Streaming two-pass path.
# Pass 1: per-channel spatial sums, streamed over lane-aligned spatial tiles
#         (f32 accumulation directly in the output block; ragged tail masked).
# ---------------------------------------------------------------------------
def _pool_kernel(x_ref, sums_ref, *, thw, per_g, n_hw, hw_total):
    # Grid: (batch, hw_group, hw_tile); sums_ref is one (1, C, 1) f32 block
    # per (batch, group), revisited across the hw_tile (reduction) axis.
    g = pl.program_id(1)
    k = pl.program_id(2)

    @pl.when(k == 0)
    def _():
        sums_ref[...] = jnp.zeros_like(sums_ref)

    # Global spatial-tile index. Group 1 indexes its tiles from the end of the
    # range, so it never reads past the array; if the two groups overlap by
    # one tile (odd n_hw) the duplicate is masked to zero below.
    b = k + g * (n_hw - per_g)
    start = b * thw

    x = x_ref[...]                                              # (1, C, thw)
    lane = jax.lax.broadcasted_iota(jnp.int32, (1, 1, x.shape[-1]), 2)
    in_range = (start + lane) < hw_total                        # ragged tail
    not_dup = jnp.logical_or(g == 0, b >= per_g)                # overlap dedup
    mask = jnp.logical_and(in_range, not_dup)
    part = jnp.sum(jnp.where(mask, x, jnp.zeros_like(x)),
                   axis=-1, dtype=jnp.float32)                  # (1, C) f32
    sums_ref[...] += part[:, :, None]


def _pool_call(x, thw, n_grp, per_g, n_hw, vmem_limit):
    N, C, HW = x.shape
    kernel = functools.partial(_pool_kernel, thw=thw, per_g=per_g,
                               n_hw=n_hw, hw_total=HW)
    return pl.pallas_call(
        kernel,
        out_shape=jax.ShapeDtypeStruct((N * n_grp, C, 1), jnp.float32),
        grid_spec=pltpu.PrefetchScalarGridSpec(
            num_scalar_prefetch=0,
            grid=(N, n_grp, per_g),                 # reduction (spatial) last
            in_specs=[
                pl.BlockSpec(
                    (1, C, thw),
                    lambda n, g, k: (n, 0, k + g * (n_hw - per_g))),
            ],
            out_specs=pl.BlockSpec(
                (1, C, 1), lambda n, g, k: (n * n_grp + g, 0, 0)),
        ),
        compiler_params=pltpu.CompilerParams(
            dimension_semantics=("parallel", "parallel", "arbitrary"),
            vmem_limit_bytes=vmem_limit),
    )(x)


# Pass 2: broadcast multiply, streamed over spatial tiles (HBM roofline).
def _scale_mul_kernel(x_ref, s_ref, o_ref):
    x = x_ref[...]                                   # (1, C, thw) native dtype
    o_ref[...] = x * s_ref[...].astype(x.dtype)      # s: (1, C, 1) broadcasts


def _scale_mul_call(x, s, thw, vmem_limit):
    N, C, HW = x.shape
    n_hw = pl.cdiv(HW, thw)
    # NOTE: if a profile shows exposed DMA between steps here, add
    # pipeline_mode=pl.Buffered(3) to the x BlockSpec (compute is ~zero).
    return pl.pallas_call(
        _scale_mul_kernel,
        out_shape=jax.ShapeDtypeStruct((N, C, HW), x.dtype),
        grid_spec=pltpu.PrefetchScalarGridSpec(
            num_scalar_prefetch=0,
            grid=(N, n_hw),
            in_specs=[
                pl.BlockSpec((1, C, thw), lambda n, k: (n, 0, k)),
                pl.BlockSpec((1, C, 1), lambda n, k: (n, 0, 0)),
            ],
            out_specs=pl.BlockSpec((1, C, thw), lambda n, k: (n, 0, k)),
        ),
        compiler_params=pltpu.CompilerParams(
            dimension_semantics=("parallel", "parallel"),
            vmem_limit_bytes=vmem_limit),
    )(x, s)


# ---------------------------------------------------------------------------
# Wrapper
# ---------------------------------------------------------------------------
def channelwise(x_nchw, w1, w2, *, force_two_pass=False, fused_batch_block=None,
                stream_tile_hw=None, stream_hw_groups=None):
    """ChannelWise (SE) forward.

    x_nchw: (N, C, H, W)
    w1: (C//r, C)   -- Conv2d(C, C//r, 1, bias=False) weight, 1x1 squeezed
    w2: (C, C//r)   -- Conv2d(C//r, C, 1, bias=False) weight, 1x1 squeezed
    Keyword-only args are test/tuning overrides; defaults auto-select.
    """
    N, C, H, W = x_nchw.shape
    HW = H * W
    itemsize = jnp.dtype(x_nchw.dtype).itemsize
    x = x_nchw.reshape(N, C, HW)

    # Pre-transpose (and upcast) the tiny 1x1-conv weights once so kernels /
    # the XLA epilogue do plain row-major matmuls (no in-kernel transpose).
    w1t = jnp.asarray(w1, jnp.float32).T          # (C, Cr)
    w2t = jnp.asarray(w2, jnp.float32).T          # (Cr, C)

    vmem_limit, tile_bytes, multi_tc = _tpu_config()
    slab_bytes = C * HW * itemsize                # one batch element's slab

    # --- fused single-pass path: 1 read + 1 write of x ----------------------
    # Eligible whenever one batch-block fits a quarter of the VMEM budget
    # (2x input + 2x output double-buffered blocks), not a fixed 2 MiB cutoff.
    fused_block_budget = max(1 << 20, (vmem_limit - (2 << 20)) // 4)
    if (not force_two_pass) and slab_bytes <= fused_block_budget:
        if fused_batch_block is not None:
            nb = max(1, min(N, int(fused_batch_block)))
        else:
            nb = max(1, min(N, fused_block_budget // max(slab_bytes, 1)))
            # Prefer >= 4 grid steps (input/output DMA overlap, both v7x TCs
            # busy) as long as blocks stay >= ~1 MiB.  Otherwise keep the
            # largest block that fits: single-TC v5e/v6e gain nothing from
            # splitting, so no cdiv(N, 2) cap there.
            nb4 = pl.cdiv(N, 4)
            if nb4 * slab_bytes >= (1 << 20):
                nb = min(nb, nb4)
            elif multi_tc and N >= 2:
                nb = min(nb, pl.cdiv(N, 2))       # keep both TensorCores busy
        out = _fused_call(x, w1t, w2t, nb, vmem_limit)
        return out.reshape(N, C, H, W)

    # --- streaming two-pass path: 2 reads + 1 write of x --------------------
    # Spatial tile: multiple of 128 lanes or the full extent.  No jnp.pad /
    # output slice (each was a full extra HBM pass); ragged tail handled
    # inside the kernels instead.
    bytes_per_hw = max(C * itemsize, 1)
    thw = int(stream_tile_hw) if stream_tile_hw is not None \
        else tile_bytes // bytes_per_hw
    if thw >= HW:
        thw = HW                                  # single full-extent block
    else:
        thw = max(128, (thw // 128) * 128)
        if thw >= HW:
            thw = HW
    n_hw = pl.cdiv(HW, thw)

    # Pass-1 parallelism when N == 1 on a 2-TensorCore part: split the spatial
    # reduction into two parallel groups so both cores get work.
    if stream_hw_groups is not None:
        want_split = int(stream_hw_groups) >= 2
    else:
        want_split = multi_tc and N == 1
    n_grp = 2 if (want_split and n_hw >= 2) else 1
    per_g = pl.cdiv(n_hw, n_grp)

    sums = _pool_call(x, thw, n_grp, per_g, n_hw, vmem_limit)   # (N*G, C, 1)
    pooled = sums.reshape(N, n_grp, C).sum(axis=1) * (1.0 / float(HW))  # (N, C)
    # The two 1x1 convs + ReLU + Sigmoid are O(N*C*Cr) flops on a tiny matrix;
    # plain XLA on the pooled matrix is the right place for them here.
    h = jnp.maximum(pooled @ w1t, 0.0)                          # (N, Cr)
    s = jax.nn.sigmoid(h @ w2t).reshape(N, C, 1)                # (N, C, 1) f32
    out = _scale_mul_call(x, s, thw, vmem_limit)                # (N, C, HW)
    return out.reshape(N, C, H, W)


def channelwise_ref(x, w1, w2):
    pooled = jnp.mean(x, axis=(2, 3))                           # (N, C)
    h = jnp.maximum(pooled @ w1.T, 0.0)                         # (N, Cr)
    s = jax.nn.sigmoid(h @ w2.T)                                # (N, C)
    return x * s[:, :, None, None]


if __name__ == "__main__":
    # Small shapes consistent with the module: batch=2, channels=16, 16x16.
    N, C, H, W = 2, 16, 16, 16
    reduction = 4
    Cr = C // reduction

    key = jax.random.PRNGKey(0)
    kx, k1, k2 = jax.random.split(key, 3)

    x = jax.random.normal(kx, (N, C, H, W), dtype=jnp.float32)
    # Conv2d(C, C//r, 1, bias=False) weight (C//r, C, 1, 1) -> (C//r, C)
    w1 = jax.random.normal(k1, (Cr, C), dtype=jnp.float32) * (1.0 / np.sqrt(C))
    # Conv2d(C//r, C, 1, bias=False) weight (C, C//r, 1, 1) -> (C, C//r)
    w2 = jax.random.normal(k2, (C, Cr), dtype=jnp.float32) * (1.0 / np.sqrt(Cr))

    # 1) Fused single-pass path (the default for slabs that fit VMEM).
    ref = channelwise_ref(x, w1, w2)
    out_fused = channelwise(x, w1, w2)
    jax.block_until_ready(out_fused)
    np.testing.assert_allclose(np.asarray(out_fused), np.asarray(ref),
                               rtol=1e-5, atol=1e-5)

    # 2) Fused path with a batch block that does not divide N (partial block).
    x3 = jax.random.normal(kx, (3, C, H, W), dtype=jnp.float32)
    ref3 = channelwise_ref(x3, w1, w2)
    out3 = channelwise(x3, w1, w2, fused_batch_block=2)
    jax.block_until_ready(out3)
    np.testing.assert_allclose(np.asarray(out3), np.asarray(ref3),
                               rtol=1e-5, atol=1e-5)

    # 3) Streaming two-pass path with a ragged spatial tail (HW=320, tile=128).
    xr = jax.random.normal(k1, (N, C, 16, 20), dtype=jnp.float32)
    refr = channelwise_ref(xr, w1, w2)
    outr = channelwise(xr, w1, w2, force_two_pass=True, stream_tile_hw=128)
    jax.block_until_ready(outr)
    np.testing.assert_allclose(np.asarray(outr), np.asarray(refr),
                               rtol=1e-5, atol=1e-5)

    # 4) Streaming path, N == 1 with 2 parallel pass-1 groups (odd #tiles, so
    #    the overlapping tile must be counted exactly once via the mask).
    x1 = jax.random.normal(k2, (1, C, 16, 20), dtype=jnp.float32)
    ref1 = channelwise_ref(x1, w1, w2)
    out1 = channelwise(x1, w1, w2, force_two_pass=True, stream_tile_hw=128,
                       stream_hw_groups=2)
    jax.block_until_ready(out1)
    np.testing.assert_allclose(np.asarray(out1), np.asarray(ref1),
                               rtol=1e-5, atol=1e-5)

    print("KERNEL_OK")
</pallas_src>

<mosaic_0001>
module attributes {stable_mosaic.version = 11 : i64} {
  func.func @_fused_kernel(%arg0: i32, %arg1: memref<2x16x256xf32, #tpu.memory_space<vmem>>, %arg2: memref<16x4xf32, #tpu.memory_space<vmem>>, %arg3: memref<4x16xf32, #tpu.memory_space<vmem>>, %arg4: memref<2x16x256xf32, #tpu.memory_space<vmem>>) attributes {dimension_semantics = [#tpu.dimension_semantics<parallel>], iteration_bounds = array<i64: 1>, scalar_prefetch = 0 : i64, scratch_operands = 0 : i64, tpu.core_type = #tpu.core_type<tc>, window_params = [{transform_indices = @transform_0, window_bounds = array<i64: 2, 16, 256>}, {pipeline_mode = #tpu.pipeline_mode<synchronous>, transform_indices = @transform_1, window_bounds = array<i64: 16, 4>}, {pipeline_mode = #tpu.pipeline_mode<synchronous>, transform_indices = @transform_2, window_bounds = array<i64: 4, 16>}, {transform_indices = @transform_3, window_bounds = array<i64: 2, 16, 256>}]} {
    %c0 = arith.constant 0 : index
    %c0_0 = arith.constant 0 : index
    %c0_1 = arith.constant 0 : index
    %0 = vector.load %arg1[%c0, %c0_0, %c0_1] : memref<2x16x256xf32, #tpu.memory_space<vmem>>, vector<2x16x256xf32>
    %cst = arith.constant dense<0.000000e+00> : vector<2x16xf32>
    %1 = vector.multi_reduction <add>, %0, %cst [2] : vector<2x16x256xf32> to vector<2x16xf32>
    %cst_2 = arith.constant 2.560000e+02 : f32
    %2 = vector.broadcast %cst_2 : f32 to vector<2x16xf32>
    %3 = arith.divf %1, %2 : vector<2x16xf32>
    %c0_3 = arith.constant 0 : index
    %c0_4 = arith.constant 0 : index
    %4 = vector.load %arg2[%c0_3, %c0_4] : memref<16x4xf32, #tpu.memory_space<vmem>>, vector<16x4xf32>
    %cst_5 = arith.constant dense<0.000000e+00> : vector<2x4xf32>
    %5 = tpu.matmul %3, %4, %cst_5 {dimension_numbers = #tpu.dot_dimension_numbers<[1], [0], [0], [1], [0, 0, 1, 1], [], []>} : vector<2x16xf32>, vector<16x4xf32>, vector<2x4xf32> -> vector<2x4xf32>
    %cst_6 = arith.constant 0.000000e+00 : f32
    %6 = vector.broadcast %cst_6 : f32 to vector<2x4xf32>
    %7 = arith.maximumf %5, %6 : vector<2x4xf32>
    %c0_7 = arith.constant 0 : index
    %c0_8 = arith.constant 0 : index
    %8 = vector.load %arg3[%c0_7, %c0_8] : memref<4x16xf32, #tpu.memory_space<vmem>>, vector<4x16xf32>
    %cst_9 = arith.constant dense<0.000000e+00> : vector<2x16xf32>
    %9 = tpu.matmul %7, %8, %cst_9 {dimension_numbers = #tpu.dot_dimension_numbers<[1], [0], [0], [1], [0, 0, 1, 1], [], []>} : vector<2x4xf32>, vector<4x16xf32>, vector<2x16xf32> -> vector<2x16xf32>
    %10 = arith.negf %9 : vector<2x16xf32>
    %11 = math.exp %10 : vector<2x16xf32>
    %cst_10 = arith.constant 1.000000e+00 : f32
    %12 = vector.broadcast %cst_10 : f32 to vector<2x16xf32>
    %13 = arith.addf %12, %11 : vector<2x16xf32>
    %14 = arith.divf %12, %13 : vector<2x16xf32>
    %15 = vector.shape_cast %14 : vector<2x16xf32> to vector<2x16x1xf32>
    %16 = vector.broadcast %15 : vector<2x16x1xf32> to vector<2x16x256xf32>
    %17 = arith.mulf %0, %16 : vector<2x16x256xf32>
    %c0_11 = arith.constant 0 : index
    %c0_12 = arith.constant 0 : index
    %c0_13 = arith.constant 0 : index
    %18 = vector.load %arg4[%c0_11, %c0_12, %c0_13] : memref<2x16x256xf32, #tpu.memory_space<vmem>>, vector<2x16x256xf32>
    tpu.vector_store %arg4[%c0_11, %c0_12, %c0_13], %17 {strides = array<i32>} : memref<2x16x256xf32, #tpu.memory_space<vmem>>, vector<2x16x256xf32>,
    return
  }
  func.func @transform_0(%arg0: i32) -> (i32, i32, i32) {
    %c0_i32 = arith.constant 0 : i32
    %c0_i32_0 = arith.constant 0 : i32
    %c0_i32_1 = arith.constant 0 : i32
    return %arg0, %c0_i32, %c0_i32_0 : i32, i32, i32
  }
  func.func @transform_1(%arg0: i32) -> (i32, i32) {
    %c0_i32 = arith.constant 0 : i32
    %c0_i32_0 = arith.constant 0 : i32
    %c0_i32_1 = arith.constant 0 : i32
    return %c0_i32, %c0_i32_0 : i32, i32
  }
  func.func @transform_2(%arg0: i32) -> (i32, i32) {
    %c0_i32 = arith.constant 0 : i32
    %c0_i32_0 = arith.constant 0 : i32
    %c0_i32_1 = arith.constant 0 : i32
    return %c0_i32, %c0_i32_0 : i32, i32
  }
  func.func @transform_3(%arg0: i32) -> (i32, i32, i32) {
    %c0_i32 = arith.constant 0 : i32
    %c0_i32_0 = arith.constant 0 : i32
    %c0_i32_1 = arith.constant 0 : i32
    return %arg0, %c0_i32, %c0_i32_0 : i32, i32, i32
  }
}

</mosaic_0001>

<bundles_post_ra>
// kernel: tpu_custom_call.1
= control target key start
LH: loop header
LB: loop body
LE: loop exit
PB: predicated region body
PF: predicated region fallthrough
CT: control target
= control target key end

     0   :  { %8 = vsyncpa [#allocation3], 0  ;;  %s363_s0 = inlined_call_operand.hbm [shape: f32[2,16,256], index: 0, kind: input, shape index: {}]   ;;  %s364_s1 = inlined_call_operand.vmem [shape: f32[16,4], index: 1, kind: input, shape index: {}]   ;;  %s365_s2 = inlined_call_operand.vmem [shape: f32[4,16], index: 2, kind: input, shape index: {}]   ;;  %s366_s3 = inlined_call_operand.hbm [shape: f32[2,16,256], index: 3, kind: output, shape index: {}]  }
   0x1   :  { %9 = vsyncpa [#allocation4], 0  ;;  %s14_s14 = sshll.u32 %s363_s0, 4  ;;  %s285_s15 = smov [#allocation2]   ;;  %s15_s14 = int_to_ptr.hbm [resolvable:$true] %s14_s14 }
   0x2   :  { %s16_s16 = sshll.u32 %s285_s15, 4  ;;  %s286_s17 = smov 256   ;;  %s17_s16 = int_to_ptr.vmem [resolvable:$true] %s16_s16 }
   0x3   :  { %s287_s18 = smov 16  }
   0x4   :  { %22 = dma.hbm_to_vmem [thread:$0]  %s15_s14, 1024, %s17_s16, [#allocation3], %s286_s17, %s286_s17, %s287_s18  }
   0x5   :  { %281 = dma.done.wait [#allocation3], 1024  }
   0x6   :  { %282 = vsyncadd [#allocation3], 4294966272  ;;  %v316_v0 = vld [vmem:[#allocation2 + $0x20] sm:$0xff]  ;;  %v318_v1 = vld [vmem:[#allocation2 + $0x28] sm:$0xff]  ;;  %v288_v12 = vmov 256.0   ;;  %v68_v21 = vlaneseq  ;;  %vm73_vm1 = vcmask 130112  }
   0x7   :  { %v320_v2 = vld [vmem:[#allocation2] sm:$0xff]  ;;  %v45_v3 = vadd.f32 %v318_v1, %v316_v0  ;;  %v324_v4 = vld [vmem:[#allocation2 + $0x8] sm:$0xff]  ;;  %v328_v6 = vld [vmem:[#allocation2 + $0x30] sm:$0xff]  ;;  %227 = vrcp.f32 %v288_v12  ;;  %vm78_vm2 = vcmask 1041409   ;;  %vm80_vm3 = vcmask 130048   ;;  %s200_s26 = sshll.u32 %s366_s3, 4  ;;  %s201_s26 = int_to_ptr.hbm [resolvable:$true] %s200_s26 }
   0x8   :  { %v39_v5 = vadd.f32 %v324_v4, %v320_v2  ;;  %v330_v7 = vld [vmem:[#allocation2 + $0x38] sm:$0xff]  ;;  %v332_v8 = vld [vmem:[#allocation2 + $0x10] sm:$0xff]  ;;  %v63_v13 = vld [vmem:[%s364_s1 + $0x8] sm:$0xff]  ;;  %v69_v24 = vand.u32 127, %v68_v21  ;;  %vm109_vm4 = vcmask 1043456   ;;  %vm105_vm5 = vcmask 31744  }
   0x9   :  { %46 = vadd.xlane.f32.xlu1 %v45_v3  ;;  %v334_v9 = vld [vmem:[#allocation2 + $0x18] sm:$0xff]  ;;  %v48_v10 = vadd.f32 %v330_v7, %v328_v6  ;;  %v62_v14 = vld [vmem:[%s364_s1] sm:$0xff]  ;;  %97 = vmatpush.msra.mxu0 %v63_v13  ;;  %v154_v42 = vshrl.u32 %v68_v21, 7 }
   0xa   :  { %40 = vadd.xlane.f32.xlu0 %v39_v5  ;;  %v42_v11 = vadd.f32 %v334_v9, %v332_v8  ;;  %v71_v26 = vadd.s32 4294967288, %v69_v24  ;;  %v104_v39 = vld [vmem:[%s365_s2] sm:$0xf]  ;;  %s289_s2 = smov [#allocation5]  }
   0xb   :  { %98 = vmatpush.msra.mxu0 %v62_v14  ;;  %214 = vmatpush.msk.msra.mxu1 %vm109_vm4, %v104_v39  ;;  %v161_v43 = vadd.s32 8, %v154_v42  ;;  %s198_s23 = sshll.u32 %s289_s2, 4  ;;  %s199_s23 = int_to_ptr.vmem [resolvable:$true] %s198_s23 }
   0xc   :  { %224 = vset.pattern.permute.xlu0 %v154_v42  ;;  %222 = vset.pattern.permute.xlu2 %v154_v42 }
   0xd   :  { %v228_v15 = vpop.eup %227  ;;  %225 = vset.pattern.permute.xlu1 %v161_v43 }
   0xe   :  { %v52_v16 = vmul.f32 256.0, %v228_v15  ;;  %vm56_vm0 = vweird.f32 %v228_v15 }
  0x10   :  { %v53_v17 = vsub.f32 1.0, %v52_v16 }
  0x11   :  { %49 = vadd.xlane.f32.xlu1 %v48_v10 }
  0x12   :  { %43 = vadd.xlane.f32.xlu0 %v42_v11  ;;  %v54_v18 = vmul.f32 %v228_v15, %v53_v17 }
  0x14   :  { %v55_v19 = vadd.f32 %v228_v15, %v54_v18 }
  0x16   :  { %v57_v23 = vsel %vm56_vm0, %v228_v15, %v55_v19 }
  0x7c   :  { %v47_v20 = vpop.xlane.xlu1 %46 }
  0x7d   :  { %v41_v22 = vpop.xlane.xlu0 %40  ;;  %v60_v25 = vmul.f32 %v57_v23, %v47_v20 }
  0x7e   :  { %v58_v27 = vmul.f32 %v57_v23, %v41_v22 }
  0x7f   :  { %v75_v32 = vperm.slane %v60_v25, %v69_v24 }
  0x80   :  { %v70_v34 = vperm.slane %v58_v27, %v69_v24 }
  0x84   :  { %v50_v28 = vpop.xlane.xlu1 %49 }
  0x85   :  { %v61_v29 = vmul.f32 %v57_v23, %v50_v28  ;;  %v44_v30 = vpop.xlane.xlu0 %43 }
  0x86   :  { %v59_v31 = vmul.f32 %v57_v23, %v44_v30 }
  0x87   :  { %v76_v33 = vperm.slane %v61_v29, %v71_v26 }
  0x88   :  { %v72_v35 = vperm.slane %v59_v31, %v71_v26 }
  0x89   :  { %v77_v36 = vsel %vm73_vm1, %v76_v33, %v75_v32 }
  0x8a   :  { %v74_v37 = vsel %vm73_vm1, %v72_v35, %v70_v34 }
  0x8b   :  { %v79_v38 = vsel %vm78_vm2, %v77_v36, %v74_v37 }
  0x8c   :  { %213 = vmatmul.msk.f32.vlgmr.msra.gmra.mxu0 %vm80_vm3, %v79_v38 }
 0x109   :  { %v100_v40 = vpop.f32.mrf.mxu0 }
 0x10a   :  { %v103_v41 = vmax.f32 %v100_v40, 0.0 }
 0x10c   :  { %215 = vmatmul.msk.f32.vlgmr.msra.gmra.mxu1 %vm105_vm5, %v103_v41 }
 0x189   :  { %v130_v44 = vpop.f32.mrf.mxu1 }
 0x18a   :  { %v216_v45 = vmul.f32 -1.442695, %v130_v44 }
 0x18c   :  { %229 = vpow2.f32 %v216_v45 }
 0x192   :  { %v230_v46 = vpop.eup %229 }
 0x193   :  { %v136_v47 = vadd.f32 1.0, %v230_v46 }
 0x195   :  { %231 = vrcp.f32 %v136_v47  ;;  %v148_v51 = vand.u32 2147483648, %v136_v47  ;;  %v146_v53 = vand.u32 2147483647, %v136_v47  ;;  %vm142_vm7 = vweird.f32 %v136_v47 }
 0x197   :  { %v149_v55 = vor.u32 1.1754944e-38, %v148_v51  ;;  %vm147_vm9 = vcmp.eq.f32.partialorder %v146_v53, 8.507059e+37 }
 0x19b   :  { %v232_v48 = vpop.eup %231 }
 0x19c   :  { %v138_v49 = vmul.f32 %v232_v48, %v136_v47  ;;  %vm143_vm6 = vweird.f32 %v232_v48 }
 0x19d   :  { %vm144_vm8 = vmor %vm142_vm7, %vm143_vm6 }
 0x19e   :  { %v139_v50 = vsub.f32 1.0, %v138_v49 }
 0x1a0   :  { %v140_v52 = vmul.f32 %v232_v48, %v139_v50 }
 0x1a2   :  { %v141_v54 = vadd.f32 %v232_v48, %v140_v52 }
 0x1a4   :  { %v145_v56 = vsel %vm144_vm8, %v232_v48, %v141_v54 }
 0x1a5   :  { %v150_v57 = vsel %vm147_vm9, %v149_v55, %v145_v56 }
 0x1a6   :  { %v165_v58 = vperm.slane %v150_v57, 1  ;;  %v152_v59 = vperm.slane %v150_v57, 0 }
 0x1a8   :  { %176 = vperm.xlu1 %225, %v165_v58   ;;  %170 = vperm.xlu0 %224, %v165_v58  }
 0x1a9   :  { %157 = vperm.xlu2 %222, %v152_v59  }
 0x1b0   :  { %226 = vset.pattern.permute.xlu0 %v161_v43 }
 0x1b1   :  { %223 = vset.pattern.permute.xlu2 %v161_v43 }
 0x1b9   :  { %163 = vperm.xlu2 %223, %v152_v59  }
 0x203   :  { %v158_v60 = vpop.permute.xlu2 %157 }
 0x204   :  { %v178_v61 = vmul.f32 %v158_v60, %v320_v2  ;;  %v179_v62 = vmul.f32 %v158_v60, %v324_v4 }
 0x206   :  { %186 = vst [vmem:[#allocation5] sm:$0xff] %v178_v61 }
 0x207   :  { %187 = vst [vmem:[#allocation5 + $0x8] sm:$0xff] %v179_v62 }
 0x213   :  { %v164_v63 = vpop.permute.xlu2 %163 }
 0x214   :  { %v180_v3 = vmul.f32 %v164_v63, %v332_v8  ;;  %v181_v5 = vmul.f32 %v164_v63, %v334_v9 }
 0x216   :  { %188 = vst [vmem:[#allocation5 + $0x10] sm:$0xff] %v180_v3 }
 0x217   :  { %189 = vst [vmem:[#allocation5 + $0x18] sm:$0xff] %v181_v5 }
 0x21a   :  { %v177_v10 = vpop.permute.xlu1 %176  ;;  %v171_v11 = vpop.permute.xlu0 %170 }
 0x21b   :  { %v184_v12 = vmul.f32 %v177_v10, %v328_v6  ;;  %v185_v13 = vmul.f32 %v177_v10, %v330_v7  ;;  %v182_v14 = vmul.f32 %v171_v11, %v316_v0  ;;  %v183_v2 = vmul.f32 %v171_v11, %v318_v1 }
 0x21d   :  { %192 = vst [vmem:[#allocation5 + $0x30] sm:$0xff] %v184_v12 }
 0x21e   :  { %193 = vst [vmem:[#allocation5 + $0x38] sm:$0xff] %v185_v13 }
 0x21f   :  { %190 = vst [vmem:[#allocation5 + $0x20] sm:$0xff] %v182_v14 }
 0x220   :  { %191 = vst [vmem:[#allocation5 + $0x28] sm:$0xff] %v183_v2 }
 0x221   :  { %206 = dma.vmem_to_hbm [thread:$0]  %s199_s23, 1024, %s201_s26, [#allocation4], %s286_s17, %s286_s17, %s287_s18  }
 0x222   :  { %283 = dma.done.wait [#allocation4], 1024  }
 0x223   :  { %284 = vsyncadd [#allocation4], 4294966272 }
 0x224   :  { %211 = vsyncpa [#allocation3], 1 }
 0x225   :  { %212 = vsyncpa [#allocation4], 1 }

</bundles_post_ra>
